<compile_context>
chip_gen: v7x
topology: tpu7x:2x2x1
jax: 0.10.0
libtpu: 0.0.40
codegen_flags: <defaults>
</compile_context>

<pallas_src>
import functools
import math

import jax
import jax.numpy as jnp
from jax.experimental import pallas as pl
from jax.experimental.pallas import tpu as pltpu


_INV_SQRT2 = 1.0 / math.sqrt(2.0)


def _mlp_kernel(x_ref, w1_ref, b1_ref, w2_ref, b2_ref, o_ref, acc_ref,
                *, n_sub, tc, gelu_dtype):
    # x_ref : (TM, H)   token tile (block index constant over k -> resident)
    # w1_ref: (H, TK)   fc1 weight slice (transposed vs torch)
    # b1_ref: (1, TK)   fc1 bias slice
    # w2_ref: (TK, H)   fc2 weight slice (transposed vs torch)
    # b2_ref: (1, H)    fc2 bias
    # o_ref : (TM, H)   output tile (same block over k -> accumulator pattern)
    # acc_ref: (TM, H)  f32 VMEM accumulator
    k = pl.program_id(1)

    @pl.when(k == 0)
    def _():
        acc_ref[...] = jnp.zeros_like(acc_ref)

    x = x_ref[...]

    # Sub-chunk the TK slice so GELU (VPU) of one chunk overlaps the MXU work
    # of the neighbouring chunks, instead of one long fc1 -> erf -> fc2 chain.
    for c in range(n_sub):
        lo = c * tc  # static, lane/sublane-aligned (tc multiple of 128 or == TK)

        # fc1 sub-chunk (f32 accumulation on the MXU)
        h = jnp.dot(x, w1_ref[:, lo:lo + tc], preferred_element_type=jnp.float32)

        # bias + exact (erf) GELU, in bf16 on bf16-VALU chips, else f32
        h = h.astype(gelu_dtype) + b1_ref[:, lo:lo + tc].astype(gelu_dtype)
        h = 0.5 * h * (1.0 + jax.lax.erf(h * _INV_SQRT2))

        # dropout -> identity (inference)
        # TODO(synk): training-mode dropout would use pltpu.prng_seed / prng_random_bits.

        # fc2 partial product: MXU fed in the activations' native dtype,
        # f32 accumulation into the VMEM scratch.
        acc_ref[...] += jnp.dot(
            h.astype(x.dtype), w2_ref[lo:lo + tc, :],
            preferred_element_type=jnp.float32,
        )

    @pl.when(k == pl.num_programs(1) - 1)
    def _():
        o_ref[...] = (acc_ref[...] + b2_ref[...]).astype(o_ref.dtype)


def _round_up(n, m):
    return ((n + m - 1) // m) * m


def _tpu_generation():
    """Best-effort TPU generation from the device kind string."""
    try:
        kind = jax.devices()[0].device_kind.lower()
    except Exception:
        return 6
    if "7" in kind:
        return 7
    if "v6" in kind:
        return 6
    if "v5" in kind:
        return 5
    return 6


def _pick_nsub(tk):
    # Sub-chunk count: 2-4 lane-aligned chunks when TK allows it.
    for n in (4, 3, 2):
        if tk % n == 0 and (tk // n) % 128 == 0:
            return n
    return 1


def _pick_tiles(T, H, M, x_dtype, w_dtype, gen):
    """Pick (TM, TK, NSUB, vmem_limit_bytes) under a generation-aware VMEM budget,
    minimizing weight HBM re-streaming."""
    x_bytes = jnp.dtype(x_dtype).itemsize
    w_bytes = jnp.dtype(w_dtype).itemsize
    # sublane packing: f32 -> 8 rows, bf16 -> 16, int8/fp8 -> 32
    row_mult = 8 if x_bytes >= 4 else (16 if x_bytes == 2 else 32)

    if gen == 7:
        budget, vmem_limit = 44 << 20, 56 << 20       # 64 MiB physical / TC
    else:
        budget, vmem_limit = 88 << 20, 100 << 20      # 128 MiB physical

    tm_cap = _round_up(T, row_mult)
    if gen == 7 and T > row_mult:
        # 2 TensorCores per chip: keep n_i >= 2 so the parallel axis shards.
        tm_cap = min(tm_cap, _round_up(-(-T // 2), row_mult))

    tms = [tm for tm in (2048, 1024, 512, 256, 128, 64, 32, 16, 8)
           if tm <= tm_cap and tm % row_mult == 0]
    if tm_cap <= 2048 and tm_cap not in tms:
        tms = [tm_cap] + tms
    if not tms:
        tms = [tm_cap]

    tks = [M] + [tk for tk in (2048, 1024, 512, 256, 128)
                 if tk < M and M % tk == 0]

    w_slab = 2 * H * M * w_bytes   # both weight matrices, one full fetch
    best = None
    for tm in tms:
        n_i = _round_up(T, tm) // tm
        for tk in tks:
            nsub = _pick_nsub(tk)
            tc = tk // nsub
            vmem = (4 * tm * H * x_bytes            # x + out, double-buffered
                    + 4 * tk * H * w_bytes          # w1 + w2 slices, double-buffered
                    + 2 * (tk + H) * w_bytes        # biases, double-buffered
                    + tm * H * 4                    # f32 accumulator scratch
                    + 2 * tm * tc * (4 + x_bytes))  # live GELU temps
            if vmem > budget:
                continue
            fetches = 1 if tk == M else n_i         # weight DMA repetitions
            key = (fetches * w_slab, -(tm * tk))
            if best is None or key < best[0]:
                best = (key, (tm, tk, nsub))

    if best is None:   # pathological shapes: fall back to the smallest tiles
        tm, tk = min(tms), min(tks)
        return tm, tk, _pick_nsub(tk), vmem_limit
    tm, tk, nsub = best[1]
    return tm, tk, nsub, vmem_limit


def mlp_forward(x, w1, b1, w2, b2):
    """x: (B, S, H) -> (B, S, H). Weights: w1 (H, M), b1 (M,), w2 (M, H), b2 (H,)."""
    B, S, H = x.shape
    M = w1.shape[1]
    T = B * S

    gen = _tpu_generation()
    TM, TK, NSUB, vmem_limit = _pick_tiles(T, H, M, x.dtype, w1.dtype, gen)
    T_pad = _round_up(T, TM)

    xt = x.reshape(T, H)
    if T_pad != T:
        xt = jnp.pad(xt, ((0, T_pad - T), (0, 0)))
    b1_2d = b1.reshape(1, M)
    b2_2d = b2.reshape(1, H)

    n_i = T_pad // TM   # token tiles  (parallel; sharded across TCs on v7x)
    n_k = M // TK       # mlp_dim reduction steps (arbitrary, trailing axis)

    # GELU in bf16 only where the VALU is bf16-capable (v6e/v7x) and the input
    # is already bf16 (fc2 consumes bf16 in that case anyway). v5e stays f32.
    gelu_dtype = (jnp.bfloat16
                  if (x.dtype == jnp.bfloat16 and gen in (6, 7))
                  else jnp.float32)

    x_bytes = jnp.dtype(x.dtype).itemsize
    w_bytes = jnp.dtype(w1.dtype).itemsize
    w_fetches = 1 if n_k == 1 else n_i
    cost = pl.CostEstimate(
        flops=2 * 2 * T_pad * H * M,                 # two matmuls
        transcendentals=T_pad * M,                   # erf per intermediate elem
        bytes_accessed=(2 * T_pad * H * x_bytes      # x in + y out
                        + w_fetches * (H * M + M + M * H + H) * w_bytes),
    )

    kernel = functools.partial(_mlp_kernel, n_sub=NSUB, tc=TK // NSUB,
                               gelu_dtype=gelu_dtype)

    out = pl.pallas_call(
        kernel,
        out_shape=jax.ShapeDtypeStruct((T_pad, H), x.dtype),
        grid=(n_i, n_k),
        in_specs=[
            pl.BlockSpec((TM, H), lambda i, k: (i, 0)),   # x tile, resident over k
            pl.BlockSpec((H, TK), lambda i, k: (0, k)),   # fc1 weight slice
            pl.BlockSpec((1, TK), lambda i, k: (0, k)),   # fc1 bias slice
            pl.BlockSpec((TK, H), lambda i, k: (k, 0)),   # fc2 weight slice
            pl.BlockSpec((1, H), lambda i, k: (0, 0)),    # fc2 bias
        ],
        out_specs=pl.BlockSpec((TM, H), lambda i, k: (i, 0)),
        scratch_shapes=[pltpu.VMEM((TM, H), jnp.float32)],
        compiler_params=pltpu.CompilerParams(
            dimension_semantics=("parallel", "arbitrary"),
            vmem_limit_bytes=vmem_limit,
        ),
        cost_estimate=cost,
    )(xt, w1, b1_2d, w2, b2_2d)

    if T_pad != T:
        out = out[:T]
    return out.reshape(B, S, H)


def init_mlp_params(key, hidden_size, mlp_dim, dtype=jnp.float32):
    """Deterministic init matching Mlp._init_weights:
    xavier_uniform weights, normal(std=1e-6) biases."""
    k1, k2, k3, k4 = jax.random.split(key, 4)
    bound1 = math.sqrt(6.0 / (hidden_size + mlp_dim))
    bound2 = math.sqrt(6.0 / (mlp_dim + hidden_size))
    w1 = jax.random.uniform(k1, (hidden_size, mlp_dim), dtype, -bound1, bound1)
    w2 = jax.random.uniform(k2, (mlp_dim, hidden_size), dtype, -bound2, bound2)
    b1 = (1e-6 * jax.random.normal(k3, (mlp_dim,))).astype(dtype)
    b2 = (1e-6 * jax.random.normal(k4, (hidden_size,))).astype(dtype)
    return w1, b1, w2, b2


def _reference(x, w1, b1, w2, b2):
    h = x @ w1 + b1
    h = 0.5 * h * (1.0 + jax.lax.erf(h * _INV_SQRT2))
    return h @ w2 + b2


if __name__ == "__main__":
    key = jax.random.PRNGKey(0)

    # Case 1: config consistent with the module (hidden_size=32, mlp_dim=128)
    B, S, H, M = 2, 8, 32, 128
    kx, kp, kx2, kp2 = jax.random.split(key, 4)
    x = jax.random.normal(kx, (B, S, H), dtype=jnp.float32)
    w1, b1, w2, b2 = init_mlp_params(kp, H, M)
    y = jax.block_until_ready(mlp_forward(x, w1, b1, w2, b2))
    y_ref = _reference(x, w1, b1, w2, b2)
    assert y.shape == (B, S, H)
    assert jnp.allclose(y, y_ref, atol=1e-5, rtol=1e-5)

    # Case 2: exercises token padding and the in-kernel TK sub-chunking (NSUB>1)
    B2, S2, H2, M2 = 3, 7, 32, 384
    x2 = jax.random.normal(kx2, (B2, S2, H2), dtype=jnp.float32)
    w1b, b1b, w2b, b2b = init_mlp_params(kp2, H2, M2)
    y2 = jax.block_until_ready(mlp_forward(x2, w1b, b1b, w2b, b2b))
    y2_ref = _reference(x2, w1b, b1b, w2b, b2b)
    assert y2.shape == (B2, S2, H2)
    assert jnp.allclose(y2, y2_ref, atol=1e-5, rtol=1e-5)

    print("KERNEL_OK")
</pallas_src>

<mosaic_0001>
module attributes {stable_mosaic.version = 11 : i64} {
  func.func @_mlp_kernel(%arg0: i32, %arg1: i32, %arg2: memref<16x32xf32, #tpu.memory_space<vmem>>, %arg3: memref<32x128xf32, #tpu.memory_space<vmem>>, %arg4: memref<1x128xf32, #tpu.memory_space<vmem>>, %arg5: memref<128x32xf32, #tpu.memory_space<vmem>>, %arg6: memref<1x32xf32, #tpu.memory_space<vmem>>, %arg7: memref<16x32xf32, #tpu.memory_space<vmem>>, %arg8: memref<16x32xf32, #tpu.memory_space<vmem>>) attributes {dimension_semantics = [#tpu.dimension_semantics<parallel>, #tpu.dimension_semantics<arbitrary>], iteration_bounds = array<i64: 1, 1>, scalar_prefetch = 0 : i64, scratch_operands = 1 : i64, tpu.core_type = #tpu.core_type<tc>, window_params = [{transform_indices = @transform_0, window_bounds = array<i64: 16, 32>}, {transform_indices = @transform_1, window_bounds = array<i64: 32, 128>}, {transform_indices = @transform_2, window_bounds = array<i64: 1, 128>}, {transform_indices = @transform_3, window_bounds = array<i64: 128, 32>}, {pipeline_mode = #tpu.pipeline_mode<synchronous>, transform_indices = @transform_4, window_bounds = array<i64: 1, 32>}, {transform_indices = @transform_5, window_bounds = array<i64: 16, 32>}]} {
    %c0_i32 = arith.constant 0 : i32
    %0 = arith.cmpi eq, %arg1, %c0_i32 : i32
    %1 = arith.extui %0 : i1 to i32
    %c0_i32_0 = arith.constant 0 : i32
    %2 = arith.cmpi ne, %1, %c0_i32_0 : i32
    scf.if %2 {
      %cst_18 = arith.constant 0.000000e+00 : f32
      %25 = vector.broadcast %cst_18 : f32 to vector<16x32xf32>
      %c0_19 = arith.constant 0 : index
      %c0_20 = arith.constant 0 : index
      %26 = vector.load %arg8[%c0_19, %c0_20] : memref<16x32xf32, #tpu.memory_space<vmem>>, vector<16x32xf32>
      tpu.vector_store %arg8[%c0_19, %c0_20], %25 {strides = array<i32>} : memref<16x32xf32, #tpu.memory_space<vmem>>, vector<16x32xf32>,
    } else {
    }
    %c0 = arith.constant 0 : index
    %c0_1 = arith.constant 0 : index
    %3 = vector.load %arg2[%c0, %c0_1] : memref<16x32xf32, #tpu.memory_space<vmem>>, vector<16x32xf32>
    %c0_2 = arith.constant 0 : index
    %c0_3 = arith.constant 0 : index
    %4 = vector.load %arg3[%c0_2, %c0_3] : memref<32x128xf32, #tpu.memory_space<vmem>>, vector<32x128xf32>
    %cst = arith.constant dense<0.000000e+00> : vector<16x128xf32>
    %5 = tpu.matmul %3, %4, %cst {dimension_numbers = #tpu.dot_dimension_numbers<[1], [0], [0], [1], [0, 0, 1, 1], [], []>} : vector<16x32xf32>, vector<32x128xf32>, vector<16x128xf32> -> vector<16x128xf32>
    %c0_4 = arith.constant 0 : index
    %c0_5 = arith.constant 0 : index
    %6 = vector.load %arg4[%c0_4, %c0_5] : memref<1x128xf32, #tpu.memory_space<vmem>>, vector<1x128xf32>
    %7 = vector.broadcast %6 : vector<1x128xf32> to vector<16x128xf32>
    %8 = arith.addf %5, %7 : vector<16x128xf32>
    %cst_6 = arith.constant 5.000000e-01 : f32
    %9 = vector.broadcast %cst_6 : f32 to vector<16x128xf32>
    %10 = arith.mulf %9, %8 : vector<16x128xf32>
    %cst_7 = arith.constant 0.707106769 : f32
    %11 = vector.broadcast %cst_7 : f32 to vector<16x128xf32>
    %12 = arith.mulf %8, %11 : vector<16x128xf32>
    %13 = math.erf %12 : vector<16x128xf32>
    %cst_8 = arith.constant 1.000000e+00 : f32
    %14 = vector.broadcast %cst_8 : f32 to vector<16x128xf32>
    %15 = arith.addf %14, %13 : vector<16x128xf32>
    %16 = arith.mulf %10, %15 : vector<16x128xf32>
    %c0_9 = arith.constant 0 : index
    %c0_10 = arith.constant 0 : index
    %17 = vector.load %arg8[%c0_9, %c0_10] : memref<16x32xf32, #tpu.memory_space<vmem>>, vector<16x32xf32>
    %c0_11 = arith.constant 0 : index
    %c0_12 = arith.constant 0 : index
    %18 = vector.load %arg5[%c0_11, %c0_12] : memref<128x32xf32, #tpu.memory_space<vmem>>, vector<128x32xf32>
    %cst_13 = arith.constant dense<0.000000e+00> : vector<16x32xf32>
    %19 = tpu.matmul %16, %18, %cst_13 {dimension_numbers = #tpu.dot_dimension_numbers<[1], [0], [0], [1], [0, 0, 1, 1], [], []>} : vector<16x128xf32>, vector<128x32xf32>, vector<16x32xf32> -> vector<16x32xf32>
    %20 = arith.addf %17, %19 : vector<16x32xf32>
    %c0_14 = arith.constant 0 : index
    %c0_15 = arith.constant 0 : index
    %21 = vector.load %arg8[%c0_14, %c0_15] : memref<16x32xf32, #tpu.memory_space<vmem>>, vector<16x32xf32>
    tpu.vector_store %arg8[%c0_14, %c0_15], %20 {strides = array<i32>} : memref<16x32xf32, #tpu.memory_space<vmem>>, vector<16x32xf32>,
    %c0_i32_16 = arith.constant 0 : i32
    %22 = arith.cmpi eq, %arg1, %c0_i32_16 : i32
    %23 = arith.extui %22 : i1 to i32
    %c0_i32_17 = arith.constant 0 : i32
    %24 = arith.cmpi ne, %23, %c0_i32_17 : i32
    scf.if %24 {
      %c0_18 = arith.constant 0 : index
      %c0_19 = arith.constant 0 : index
      %25 = vector.load %arg8[%c0_18, %c0_19] : memref<16x32xf32, #tpu.memory_space<vmem>>, vector<16x32xf32>
      %c0_20 = arith.constant 0 : index
      %c0_21 = arith.constant 0 : index
      %26 = vector.load %arg6[%c0_20, %c0_21] : memref<1x32xf32, #tpu.memory_space<vmem>>, vector<1x32xf32>
      %27 = vector.broadcast %26 : vector<1x32xf32> to vector<16x32xf32>
      %28 = arith.addf %25, %27 : vector<16x32xf32>
      %c0_22 = arith.constant 0 : index
      %c0_23 = arith.constant 0 : index
      %29 = vector.load %arg7[%c0_22, %c0_23] : memref<16x32xf32, #tpu.memory_space<vmem>>, vector<16x32xf32>
      tpu.vector_store %arg7[%c0_22, %c0_23], %28 {strides = array<i32>} : memref<16x32xf32, #tpu.memory_space<vmem>>, vector<16x32xf32>,
    } else {
    }
    return
  }
  func.func @transform_0(%arg0: i32, %arg1: i32) -> (i32, i32) {
    %c0_i32 = arith.constant 0 : i32
    %c0_i32_0 = arith.constant 0 : i32
    return %arg0, %c0_i32 : i32, i32
  }
  func.func @transform_1(%arg0: i32, %arg1: i32) -> (i32, i32) {
    %c0_i32 = arith.constant 0 : i32
    %c0_i32_0 = arith.constant 0 : i32
    return %c0_i32, %arg1 : i32, i32
  }
  func.func @transform_2(%arg0: i32, %arg1: i32) -> (i32, i32) {
    %c0_i32 = arith.constant 0 : i32
    %c0_i32_0 = arith.constant 0 : i32
    return %c0_i32, %arg1 : i32, i32
  }
  func.func @transform_3(%arg0: i32, %arg1: i32) -> (i32, i32) {
    %c0_i32 = arith.constant 0 : i32
    %c0_i32_0 = arith.constant 0 : i32
    return %arg1, %c0_i32 : i32, i32
  }
  func.func @transform_4(%arg0: i32, %arg1: i32) -> (i32, i32) {
    %c0_i32 = arith.constant 0 : i32
    %c0_i32_0 = arith.constant 0 : i32
    %c0_i32_1 = arith.constant 0 : i32
    return %c0_i32, %c0_i32_0 : i32, i32
  }
  func.func @transform_5(%arg0: i32, %arg1: i32) -> (i32, i32) {
    %c0_i32 = arith.constant 0 : i32
    %c0_i32_0 = arith.constant 0 : i32
    return %arg0, %c0_i32 : i32, i32
  }
}

</mosaic_0001>

<bundles_post_ra>
// kernel: tpu_custom_call.1
= control target key start
LH: loop header
LB: loop body
LE: loop exit
PB: predicated region body
PF: predicated region fallthrough
CT: control target
= control target key end

     0   :  { %10 = vsyncpa [#allocation4], 0  ;;  %s734_s0 = inlined_call_operand.hbm [shape: f32[16,32], index: 0, kind: input, shape index: {}]   ;;  %s735_s1 = inlined_call_operand.hbm [shape: f32[32,128], index: 1, kind: input, shape index: {}]   ;;  %s736_s2 = inlined_call_operand.hbm [shape: f32[1,128], index: 2, kind: input, shape index: {}]   ;;  %s737_s3 = inlined_call_operand.hbm [shape: f32[128,32], index: 3, kind: input, shape index: {}]   ;;  %s738_s4 = inlined_call_operand.hbm [shape: f32[1,32], index: 4, kind: input, shape index: {}]   ;;  %s739_s5 = inlined_call_operand.hbm [shape: f32[16,32], index: 5, kind: output, shape index: {}]  }
   0x1   :  { %11 = vsyncpa [#allocation7], 0 }
   0x2   :  { %12 = vsyncpa [#allocation10], 0 }
   0x3   :  { %13 = vsyncpa [#allocation5], 0  ;;  %s596_s18 = smov [#allocation6]   ;;  %s597_s20 = smov [#allocation9]  }
   0x4   :  { %s31_s19 = sshll.u32 %s596_s18, 4  ;;  %s53_s21 = sshll.u32 %s597_s20, 4  ;;  %s32_s19 = int_to_ptr.vmem [resolvable:$true] %s31_s19  ;;  %s635_s21 = int_to_ptr.vmem [resolvable:$true] %s53_s21 }
   0x5   :  { %s456_s24 = scalar_lea.hbm %s735_s1, 512 }
   0x6   :  { %p457_p0 = scmp.ne.s32.totalorder %s735_s1, %s456_s24  ;;  %p460_p1 = scmp.lt.u32.totalorder %s456_s24, %s735_s1 }
   0x8   :  { %p462_p2 = pnand %p460_p1, %p457_p0 }
   0xa   :  { %465 = shalt.err (!%p462_p2)
}
   0xb   :  { %s466_s29 = scalar_lea.vmem %s32_s19, 512  ;;  %p471_p4 = scmp.lt.s32.totalorder %s32_s19, %s32_s19 }
   0xc   :  { %p467_p3 = scmp.ne.s32.totalorder %s32_s19, %s466_s29  ;;  %p472_p5 = scmp.lt.s32.totalorder %s466_s29, %s466_s29 }
   0xe   :  { %p473_p6 = por %p472_p5, %p471_p4 }
  0x10   :  { %p474_p7 = pnand %p473_p6, %p467_p3 }
  0x12   :  { %477 = shalt.err (!%p474_p7)
}
  0x13   :  { %s598_s30 = smov 128   ;;  %s599_s6 = smov 8  }
  0x14   :  { %37 = dma.hbm_to_vmem [thread:$0]  %s735_s1, 512, %s32_s19, [#allocation7], %s598_s30, %s598_s30, %s599_s6  }
  0x15   :  { %s478_s11 = scalar_lea.hbm %s737_s3, 2048 }
  0x16   :  { %p479_p8 = scmp.ne.s32.totalorder %s737_s3, %s478_s11  ;;  %p482_p9 = scmp.lt.u32.totalorder %s478_s11, %s737_s3 }
  0x18   :  { %p484_p10 = pnand %p482_p9, %p479_p8 }
  0x1a   :  { %487 = shalt.err (!%p484_p10)
}
  0x1b   :  { %s488_s16 = scalar_lea.vmem %s635_s21, 2048  ;;  %p493_p12 = scmp.lt.s32.totalorder %s635_s21, %s635_s21 }
  0x1c   :  { %p489_p11 = scmp.ne.s32.totalorder %s635_s21, %s488_s16  ;;  %p494_p13 = scmp.lt.s32.totalorder %s488_s16, %s488_s16 }
  0x1e   :  { %p495_p0 = por %p494_p13, %p493_p12 }
  0x20   :  { %p496_p1 = pnand %p495_p0, %p489_p11 }
  0x22   :  { %499 = shalt.err (!%p496_p1)
}
  0x23   :  { %59 = dma.hbm_to_vmem [thread:$0]  %s737_s3, 2048, %s635_s21, [#allocation10], %s598_s30, %s598_s30, %s599_s6  }
  0x24   :  { %s600_s18 = smov [#allocation3]   ;;  %s601_s20 = smov [#allocation8]  }
  0x25   :  { %s19_s19 = sshll.u32 %s600_s18, 4  ;;  %s44_s22 = sshll.u32 %s601_s20, 4  ;;  %s20_s19 = int_to_ptr.vmem [resolvable:$true] %s19_s19  ;;  %s45_s22 = int_to_ptr.vmem [resolvable:$true] %s44_s22 }
  0x26   :  { %s500_s25 = scalar_lea.hbm %s734_s0, 256 }
  0x27   :  { %p501_p2 = scmp.ne.s32.totalorder %s734_s0, %s500_s25  ;;  %p504_p3 = scmp.lt.u32.totalorder %s500_s25, %s734_s0 }
  0x29   :  { %p506_p4 = pnand %p504_p3, %p501_p2 }
  0x2b   :  { %509 = shalt.err (!%p506_p4)
}
  0x2c   :  { %s510_s3 = scalar_lea.vmem %s20_s19, 256  ;;  %p515_p6 = scmp.lt.s32.totalorder %s20_s19, %s20_s19 }
  0x2d   :  { %p511_p5 = scmp.ne.s32.totalorder %s20_s19, %s510_s3  ;;  %p516_p7 = scmp.lt.s32.totalorder %s510_s3, %s510_s3 }
  0x2f   :  { %p517_p8 = por %p516_p7, %p515_p6 }
  0x31   :  { %p518_p9 = pnand %p517_p8, %p511_p5 }
  0x33   :  { %521 = shalt.err (!%p518_p9)
}
  0x34   :  { %25 = dma.hbm_to_vmem [thread:$0]  %s734_s0, 256, %s20_s19, [#allocation4], %s598_s30, %s598_s30, %s599_s6  }
  0x35   :  { %s522_s10 = scalar_lea.hbm %s736_s2, 16 }
  0x36   :  { %p523_p10 = scmp.ne.s32.totalorder %s736_s2, %s522_s10  ;;  %p526_p11 = scmp.lt.u32.totalorder %s522_s10, %s736_s2 }
  0x38   :  { %p528_p12 = pnand %p526_p11, %p523_p10 }
  0x3a   :  { %531 = shalt.err (!%p528_p12)
}
  0x3b   :  { %s532_s15 = scalar_lea.vmem %s45_s22, 16  ;;  %s536_s16 = scalar_lea.vmem %s45_s22, 32 }
  0x3c   :  { %p533_p13 = scmp.ne.s32.totalorder %s45_s22, %s532_s15  ;;  %p537_p0 = scmp.lt.s32.totalorder %s45_s22, %s45_s22 }
  0x3d   :  { %p538_p1 = scmp.lt.s32.totalorder %s536_s16, %s532_s15 }
  0x3f   :  { %p539_p2 = por %p538_p1, %p537_p0 }
  0x41   :  { %p540_p3 = pnand %p539_p2, %p533_p13 }
  0x43   :  { %543 = shalt.err (!%p540_p3)
}
  0x44   :  { %47 = dma.hbm_to_vmem [thread:$0]  %s736_s2, 16, %s45_s22, [#allocation7]  }
  0x45   :  { %s602_s17 = smov [#allocation11]   ;;  %s544_s23 = scalar_lea.hbm %s738_s4, 16 }
  0x46   :  { %s66_s18 = sshll.u32 %s602_s17, 4  ;;  %p545_p4 = scmp.ne.s32.totalorder %s738_s4, %s544_s23  ;;  %s67_s18 = int_to_ptr.vmem [resolvable:$true] %s66_s18 }
  0x47   :  { %p548_p5 = scmp.lt.u32.totalorder %s544_s23, %s738_s4 }
  0x49   :  { %p550_p6 = pnand %p548_p5, %p545_p4 }
  0x4b   :  { %553 = shalt.err (!%p550_p6)
}
  0x4c   :  { %s554_s28 = scalar_lea.vmem %s67_s18, 16  ;;  %s558_s2 = scalar_lea.vmem %s67_s18, 32 }
  0x4d   :  { %p555_p7 = scmp.ne.s32.totalorder %s67_s18, %s554_s28  ;;  %p559_p8 = scmp.lt.s32.totalorder %s67_s18, %s67_s18 }
  0x4e   :  { %p560_p9 = scmp.lt.s32.totalorder %s558_s2, %s554_s28 }
  0x50   :  { %p561_p10 = por %p560_p9, %p559_p8 }
  0x52   :  { %p562_p11 = pnand %p561_p10, %p555_p7 }
  0x54   :  { %565 = shalt.err (!%p562_p11)
}
  0x55   :  { %69 = dma.hbm_to_vmem [thread:$0]  %s738_s4, 16, %s67_s18, [#allocation10]  }
  0x56   :  { %588 = dma.done.wait [#allocation4], 256  }
  0x57   :  { %589 = vsyncadd [#allocation4], 4294967040 }
  0x58   :  { %590 = dma.done.wait [#allocation7], 528  }
  0x59   :  { %591 = vsyncadd [#allocation7], 4294966768 }
  0x5a   :  { %592 = dma.done.wait [#allocation10], 2064  }
  0x5b   :  { %593 = vsyncadd [#allocation10], 4294965232  ;;  %vm89_vm0 = vcmask 261120   ;;  %v94_v0 = vld [vmem:[#allocation6] sm:$0xff]  ;;  %v95_v1 = vld [vmem:[#allocation6 + $0x8] sm:$0xff]  ;;  %v603_v32 = vmov 0.0  }
  0x5c   :  { %v96_v2 = vld [vmem:[#allocation6 + $0x10] sm:$0xff]  ;;  %v403_v3 = vpack.c.bf16 %v95_v1, %v94_v0  ;;  %v97_v4 = vld [vmem:[#allocation6 + $0x18] sm:$0xff]  ;;  %v199_v7 = vld [vmem:[#allocation9] sm:$0xff]  ;;  %91 = vst.msk [vmem:[#allocation2 + $0x8] sm:$0xff] %vm89_vm0, %v603_v32  ;;  %s604_s4 = smov [#allocation12]  }
  0x5d   :  { %v92_v5 = vld [vmem:[#allocation3] sm:$0xff]  ;;  %v407_v6 = vpack.c.bf16 %v97_v4, %v96_v2  ;;  %v202_v11 = vld [vmem:[#allocation9 + $0x18] sm:$0xff]  ;;  %v203_v13 = vld [vmem:[#allocation9 + $0x20] sm:$0xff]  ;;  %90 = vst.msk [vmem:[#allocation2] sm:$0xff] %vm89_vm0, %v603_v32  ;;  %s315_s3 = sshll.u32 %s604_s4, 4  ;;  %s316_s3 = int_to_ptr.vmem [resolvable:$true] %s315_s3 }
  0x5e   :  { %365 = vmatprep.mubr.msk.f32.mxu0 %vm89_vm0, %v92_v5  ;;  %v200_v8 = vld [vmem:[#allocation9 + $0x8] sm:$0xff]  ;;  %v201_v9 = vld [vmem:[#allocation9 + $0x10] sm:$0xff]  ;;  %404 = vmatprep.subr.bf16.mxu0 %v403_v3  ;;  %v206_v18 = vld [vmem:[#allocation9 + $0x38] sm:$0xff]  ;;  %s566_s21 = scalar_lea.vmem %s316_s3, 256  ;;  %p571_p13 = scmp.lt.s32.totalorder %s316_s3, %s316_s3 }
  0x5f   :  { %v411_v10 = vpack.c.bf16 %v200_v8, %v199_v7  ;;  %406 = vmatpush3.bf16.msra.mxu0 %v403_v3  ;;  %v415_v12 = vpack.c.bf16 %v202_v11, %v201_v9  ;;  %v204_v14 = vld [vmem:[#allocation9 + $0x28] sm:$0xff]  ;;  %v93_v16 = vld [vmem:[#allocation3 + $0x8] sm:$0xff]  ;;  %v207_v20 = vld [vmem:[#allocation9 + $0x40] sm:$0xff]  ;;  %p567_p12 = scmp.ne.s32.totalorder %s316_s3, %s566_s21  ;;  %p572_p0 = scmp.lt.s32.totalorder %s566_s21, %s566_s21 }
  0x60   :  { %408 = vmatprep.subr.bf16.mxu0 %v407_v6  ;;  %v419_v15 = vpack.c.bf16 %v204_v14, %v203_v13  ;;  %v205_v17 = vld [vmem:[#allocation9 + $0x30] sm:$0xff]  ;;  %v208_v21 = vld [vmem:[#allocation9 + $0x48] sm:$0xff]  ;;  %v210_v24 = vld [vmem:[#allocation9 + $0x58] sm:$0xff] }
  0x61   :  { %412 = vmatprep.subr.bf16.mxu1 %v411_v10  ;;  %v423_v19 = vpack.c.bf16 %v206_v18, %v205_v17  ;;  %v427_v22 = vpack.c.bf16 %v208_v21, %v207_v20  ;;  %v209_v23 = vld [vmem:[#allocation9 + $0x50] sm:$0xff]  ;;  %v211_v26 = vld [vmem:[#allocation9 + $0x60] sm:$0xff]  ;;  %v212_v27 = vld [vmem:[#allocation9 + $0x68] sm:$0xff]  ;;  %p573_p1 = por %p572_p0, %p571_p13 }
  0x62   :  { %414 = vmatpush3.bf16.msra.mxu1 %v411_v10  ;;  %v431_v25 = vpack.c.bf16 %v210_v24, %v209_v23  ;;  %v435_v28 = vpack.c.bf16 %v212_v27, %v211_v26  ;;  %v213_v29 = vld [vmem:[#allocation9 + $0x70] sm:$0xff]  ;;  %v214_v30 = vld [vmem:[#allocation9 + $0x78] sm:$0xff]  ;;  %v332_v54 = vld [vmem:[#allocation11] ss:$0 sm:$0xff] }
  0x63   :  { %416 = vmatprep.subr.bf16.mxu1 %v415_v12  ;;  %410 = vmatpush3.bf16.msra.mxu0 %v407_v6  ;;  %v439_v31 = vpack.c.bf16 %v214_v30, %v213_v29  ;;  %v329_v33 = vld [vmem:[#allocation8] ss:$0 sm:$0xff]  ;;  %v198_v48 = vld [vmem:[#allocation2 + $0x8] sm:$0xff]  ;;  %p574_p2 = pnand %p573_p1, %p567_p12 }
  0x64   :  { %v197_v49 = vld [vmem:[#allocation2] sm:$0xff] }
  0x66   :  { %418 = vmatpush3.bf16.msra.mxu1 %v415_v12  ;;  %366 = vmatmul.mubr.msk.f32.vlgmr.msra.gmra.mrb[0].mxu0 %vm89_vm0, %v93_v16 }
  0x67   :  { %420 = vmatprep.subr.bf16.mxu1 %v419_v15 }
  0x6a   :  { %422 = vmatpush3.bf16.msra.mxu1 %v419_v15 }
  0x6b   :  { %424 = vmatprep.subr.bf16.mxu1 %v423_v19 }
  0x6e   :  { %426 = vmatpush3.bf16.msra.mxu1 %v423_v19 }
  0x6f   :  { %428 = vmatprep.subr.bf16.mxu1 %v427_v22 }
  0x72   :  { %430 = vmatpush3.bf16.msra.mxu1 %v427_v22 }
  0x73   :  { %432 = vmatprep.subr.bf16.mxu1 %v431_v25 }
  0x76   :  { %434 = vmatpush3.bf16.msra.mxu1 %v431_v25 }
  0x77   :  { %436 = vmatprep.subr.bf16.mxu1 %v435_v28 }
  0x7a   :  { %438 = vmatpush3.bf16.msra.mxu1 %v435_v28 }
  0x7b   :  { %440 = vmatprep.subr.bf16.mxu1 %v439_v31 }
  0x7e   :  { %442 = vmatpush3.bf16.msra.mxu1 %v439_v31 }
 0x139   :  { %v367_v34 = vpop.f32.mrb[0].mxu0 }
 0x13a   :  { %v184_v35 = vadd.f32 %v367_v34, %v329_v33  ;;  %v178_v36 = vpop.f32.mrb[1].mxu0 }
 0x13b   :  { %v179_v37 = vadd.f32 %v329_v33, %v178_v36 }
 0x13c   :  { %v190_v38 = vmul.f32 0.70710677, %v184_v35  ;;  %v188_v45 = vmul.f32 0.5, %v184_v35 }
 0x13d   :  { %v189_v39 = vmul.f32 0.70710677, %v179_v37  ;;  %v187_v43 = vmul.f32 0.5, %v179_v37 }
 0x13e   :  { %452 = verf.f32 %v190_v38 }
 0x13f   :  { %454 = verf.f32 %v189_v39 }
 0x148   :  { %v453_v40 = vpop.eup %452 }
 0x149   :  { %v455_v41 = vpop.eup %454  ;;  %v194_v42 = vadd.f32 1.0, %v453_v40 }
 0x14a   :  { %v193_v44 = vadd.f32 1.0, %v455_v41 }
 0x14b   :  { %v196_v47 = vmul.f32 %v194_v42, %v188_v45 }
 0x14c   :  { %v195_v46 = vmul.f32 %v193_v44, %v187_v43 }
 0x14e   :  { %400 = vmatprep.mubr.f32.mxu1 %v195_v46 }
 0x14f   :  { %401 = vmatmul.mubr.f32.vlgmr.msra.gmra.mrb[0].mxu1 %v196_v47 }
 0x222   :  { %v402_v50 = vpop.f32.mrb[0].mxu1 }
 0x223   :  { %v291_v51 = vadd.f32 %v402_v50, %v198_v48  ;;  %v281_v52 = vpop.f32.mrb[1].mxu1 }
 0x224   :  { %v290_v53 = vadd.f32 %v281_v52, %v197_v49 }
 0x225   :  { %293 = vst.msk [vmem:[#allocation2 + $0x8] sm:$0xff] %vm89_vm0, %v291_v51 }
 0x226   :  { %292 = vst.msk [vmem:[#allocation2] sm:$0xff] %vm89_vm0, %v290_v53 }
 0x22c   :  { %v298_v55 = vld [vmem:[#allocation2 + $0x8] sm:$0xff] }
 0x22d   :  { %v297_v56 = vld [vmem:[#allocation2] sm:$0xff]  ;;  %v307_v57 = vadd.f32 %v332_v54, %v298_v55 }
 0x22e   :  { %v306_v58 = vadd.f32 %v332_v54, %v297_v56 }
 0x22f   :  { %309 = vst.msk [vmem:[#allocation12 + $0x8] sm:$0xff] %vm89_vm0, %v307_v57 }
 0x230   :  { %308 = vst.msk [vmem:[#allocation12] sm:$0xff] %vm89_vm0, %v306_v58 }
 0x231   :  { %577 = shalt.err (!%p574_p2)
}
 0x232   :  { %s578_s9 = scalar_lea.hbm %s739_s5, 256 }
 0x233   :  { %p579_p3 = scmp.ne.s32.totalorder %s739_s5, %s578_s9  ;;  %p582_p4 = scmp.lt.u32.totalorder %s578_s9, %s739_s5 }
 0x235   :  { %p584_p5 = pnand %p582_p4, %p579_p3 }
 0x237   :  { %587 = shalt.err (!%p584_p5)
}
 0x238   :  { %321 = dma.vmem_to_hbm [thread:$0]  %s316_s3, 256, %s739_s5, [#allocation5], %s598_s30, %s598_s30, %s599_s6  }
 0x239   :  { %594 = dma.done.wait [#allocation5], 256  }
 0x23a   :  { %595 = vsyncadd [#allocation5], 4294967040 }
 0x23b   :  { %325 = vsyncpa [#allocation4], 1 }
 0x23c   :  { %326 = vsyncpa [#allocation7], 1 }
 0x23d   :  { %327 = vsyncpa [#allocation10], 1 }
 0x23e   :  { %328 = vsyncpa [#allocation5], 1 }

</bundles_post_ra>
